<compile_context>
chip_gen: v6e
topology: v6e:2x2x1
jax: 0.10.0
libtpu: 0.0.40
codegen_flags: <defaults>
</compile_context>

<pallas_src>
import functools

import jax
import jax.numpy as jnp
from jax.experimental import pallas as pl
from jax.experimental.pallas import tpu as pltpu

LANE = 128
NEG_BIG = -1.0e30  # effectively -inf for f32 softmax masking


def _round_up(x, m):
    return ((x + m - 1) // m) * m


def mlp_kernel(x_ref, w1_ref, b1_ref, w2_ref, b2_ref, o_ref, *, out_valid):
    # x_ref : (tile_m, in_pad)  bf16
    # w1_ref: (in_pad, hid_pad) bf16   b1_ref: (1, hid_pad) f32
    # w2_ref: (hid_pad, out_pad) bf16  b2_ref: (1, out_pad) f32
    # o_ref : (tile_m, out_pad) f32

    # hidden layer: x @ W1 + b1, ReLU  (bf16 in, f32 accumulate)
    h = jnp.dot(x_ref[...], w1_ref[...], preferred_element_type=jnp.float32)
    h = jnp.maximum(h + b1_ref[...], 0.0)

    # output layer: h @ W2 + b2  (feed bf16, accumulate f32)
    logits = jnp.dot(h.astype(jnp.bfloat16), w2_ref[...],
                     preferred_element_type=jnp.float32)
    logits = logits + b2_ref[...]

    # mask padded output lanes so they contribute 0 to the softmax sum
    out_pad = logits.shape[-1]
    if out_valid < out_pad:
        col = jax.lax.broadcasted_iota(jnp.int32, logits.shape, dimension=1)
        logits = jnp.where(col < out_valid, logits, NEG_BIG)

    # softmax over dim=1, all in f32; reciprocal goes to the EUP slot
    m = jnp.max(logits, axis=1, keepdims=True)
    e = jnp.exp(logits - m)
    denom = jnp.sum(e, axis=1, keepdims=True)
    o_ref[...] = (e * pl.reciprocal(denom, approx=True)).astype(o_ref.dtype)


def mlp_forward(x, w1, b1, w2, b2, *, tile_m_max=512):
    """x: (B, in), w1: (in, hid), b1: (1, hid), w2: (hid, out), b2: (1, out)."""
    B, in_size = x.shape
    hid = w1.shape[1]
    out = w2.shape[1]

    # Lane-dense padded sizes and batch tiling.
    in_pad = _round_up(in_size, LANE)
    hid_pad = _round_up(hid, LANE)
    out_pad = _round_up(out, LANE)
    tile_m = min(tile_m_max, _round_up(B, 16))  # 16-row multiple (bf16 sublane pack)
    b_pad = _round_up(B, tile_m)

    # Host-side padding + dtype prep (bf16 matmul operands, f32 biases).
    xp = jnp.zeros((b_pad, in_pad), jnp.bfloat16).at[:B, :in_size].set(
        x.astype(jnp.bfloat16))
    w1p = jnp.zeros((in_pad, hid_pad), jnp.bfloat16).at[:in_size, :hid].set(
        w1.astype(jnp.bfloat16))
    b1p = jnp.zeros((1, hid_pad), jnp.float32).at[:, :hid].set(
        b1.reshape(1, -1).astype(jnp.float32))
    w2p = jnp.zeros((hid_pad, out_pad), jnp.bfloat16).at[:hid, :out].set(
        w2.astype(jnp.bfloat16))
    b2p = jnp.zeros((1, out_pad), jnp.float32).at[:, :out].set(
        b2.reshape(1, -1).astype(jnp.float32))

    # Rough VMEM footprint: resident weights + double-buffered x/out tiles +
    # f32 intermediates. Only raise the scoped limit when needed; cap at 64 MiB
    # so the kernel also fits v7x's smaller physical VMEM.
    est_bytes = (
        (in_pad * hid_pad + hid_pad * out_pad) * 2      # resident bf16 weights
        + (hid_pad + out_pad) * 4                       # biases (f32)
        + 2 * tile_m * in_pad * 2                       # double-buffered x tiles
        + 2 * tile_m * out_pad * 4                      # double-buffered out tiles
        + 2 * tile_m * (hid_pad + out_pad) * 4          # f32 intermediates headroom
    )
    vmem_limit = int(min(64 * 1024 * 1024, max(32 * 1024 * 1024, 2 * est_bytes)))

    grid = (b_pad // tile_m,)
    kernel = functools.partial(mlp_kernel, out_valid=out)

    out_padded = pl.pallas_call(
        kernel,
        out_shape=jax.ShapeDtypeStruct((b_pad, out_pad), jnp.float32),
        grid_spec=pltpu.PrefetchScalarGridSpec(
            num_scalar_prefetch=0,
            grid=grid,
            in_specs=[
                pl.BlockSpec((tile_m, in_pad), lambda i: (i, 0)),    # x streams per tile
                pl.BlockSpec((in_pad, hid_pad), lambda i: (0, 0)),   # W1 resident
                pl.BlockSpec((1, hid_pad), lambda i: (0, 0)),        # b1 resident
                pl.BlockSpec((hid_pad, out_pad), lambda i: (0, 0)),  # W2 resident
                pl.BlockSpec((1, out_pad), lambda i: (0, 0)),        # b2 resident
            ],
            out_specs=pl.BlockSpec((tile_m, out_pad), lambda i: (i, 0)),
        ),
        compiler_params=pltpu.CompilerParams(
            dimension_semantics=("parallel",),   # megacore / v7x second TC
            vmem_limit_bytes=vmem_limit,
        ),
    )(xp, w1p, b1p, w2p, b2p)

    return out_padded[:B, :out]


def init_params(key, input_size, hidden_size, output_size):
    # Deterministic init mimicking torch.nn.Linear: U(-1/sqrt(fan_in), 1/sqrt(fan_in)).
    k1, k2, k3, k4 = jax.random.split(key, 4)
    lim1 = 1.0 / (input_size ** 0.5)
    lim2 = 1.0 / (hidden_size ** 0.5)
    w1 = jax.random.uniform(k1, (input_size, hidden_size), jnp.float32, -lim1, lim1)
    b1 = jax.random.uniform(k2, (1, hidden_size), jnp.float32, -lim1, lim1)
    w2 = jax.random.uniform(k3, (hidden_size, output_size), jnp.float32, -lim2, lim2)
    b2 = jax.random.uniform(k4, (1, output_size), jnp.float32, -lim2, lim2)
    return w1, b1, w2, b2


if __name__ == "__main__":
    batch = 8
    input_size = 32
    hidden_size = 64
    output_size = 16

    key = jax.random.PRNGKey(0)
    kx, kp = jax.random.split(key)
    x = jax.random.normal(kx, (batch, input_size), jnp.float32)
    w1, b1, w2, b2 = init_params(kp, input_size, hidden_size, output_size)

    out = mlp_forward(x, w1, b1, w2, b2)
    out = jax.block_until_ready(out)

    # sanity check against plain-JAX f32 reference (bf16 matmul => looser tolerance)
    h_ref = jnp.maximum(x @ w1 + b1, 0.0)
    logits_ref = h_ref @ w2 + b2
    ref = jax.nn.softmax(logits_ref, axis=1)
    assert out.shape == (batch, output_size)
    assert jnp.allclose(out, ref, atol=2e-2, rtol=2e-2), float(jnp.max(jnp.abs(out - ref)))
    assert jnp.allclose(jnp.sum(out, axis=1), 1.0, atol=1e-2)

    print("KERNEL_OK")
</pallas_src>

<mosaic_0001>
module attributes {stable_mosaic.version = 11 : i64} {
  func.func @mlp_kernel(%arg0: i32, %arg1: memref<16x128xbf16, #tpu.memory_space<vmem>>, %arg2: memref<128x128xbf16, #tpu.memory_space<vmem>>, %arg3: memref<1x128xf32, #tpu.memory_space<vmem>>, %arg4: memref<128x128xbf16, #tpu.memory_space<vmem>>, %arg5: memref<1x128xf32, #tpu.memory_space<vmem>>, %arg6: memref<16x128xf32, #tpu.memory_space<vmem>>) attributes {dimension_semantics = [#tpu.dimension_semantics<parallel>], iteration_bounds = array<i64: 1>, scalar_prefetch = 0 : i64, scratch_operands = 0 : i64, tpu.core_type = #tpu.core_type<tc>, window_params = [{transform_indices = @transform_0, window_bounds = array<i64: 16, 128>}, {pipeline_mode = #tpu.pipeline_mode<synchronous>, transform_indices = @transform_1, window_bounds = array<i64: 128, 128>}, {pipeline_mode = #tpu.pipeline_mode<synchronous>, transform_indices = @transform_2, window_bounds = array<i64: 1, 128>}, {pipeline_mode = #tpu.pipeline_mode<synchronous>, transform_indices = @transform_3, window_bounds = array<i64: 128, 128>}, {pipeline_mode = #tpu.pipeline_mode<synchronous>, transform_indices = @transform_4, window_bounds = array<i64: 1, 128>}, {transform_indices = @transform_5, window_bounds = array<i64: 16, 128>}]} {
    %c0 = arith.constant 0 : index
    %c0_0 = arith.constant 0 : index
    %0 = vector.load %arg1[%c0, %c0_0] : memref<16x128xbf16, #tpu.memory_space<vmem>>, vector<16x128xbf16>
    %c0_1 = arith.constant 0 : index
    %c0_2 = arith.constant 0 : index
    %1 = vector.load %arg2[%c0_1, %c0_2] : memref<128x128xbf16, #tpu.memory_space<vmem>>, vector<128x128xbf16>
    %cst = arith.constant dense<0.000000e+00> : vector<16x128xf32>
    %2 = tpu.matmul %0, %1, %cst {dimension_numbers = #tpu.dot_dimension_numbers<[1], [0], [0], [1], [0, 0, 1, 1], [], []>} : vector<16x128xbf16>, vector<128x128xbf16>, vector<16x128xf32> -> vector<16x128xf32>
    %c0_3 = arith.constant 0 : index
    %c0_4 = arith.constant 0 : index
    %3 = vector.load %arg3[%c0_3, %c0_4] : memref<1x128xf32, #tpu.memory_space<vmem>>, vector<1x128xf32>
    %4 = vector.broadcast %3 : vector<1x128xf32> to vector<16x128xf32>
    %5 = arith.addf %2, %4 : vector<16x128xf32>
    %cst_5 = arith.constant 0.000000e+00 : f32
    %6 = vector.broadcast %cst_5 : f32 to vector<16x128xf32>
    %7 = arith.maximumf %5, %6 : vector<16x128xf32>
    %8 = arith.truncf %7 : vector<16x128xf32> to vector<16x128xbf16>
    %c0_6 = arith.constant 0 : index
    %c0_7 = arith.constant 0 : index
    %9 = vector.load %arg4[%c0_6, %c0_7] : memref<128x128xbf16, #tpu.memory_space<vmem>>, vector<128x128xbf16>
    %cst_8 = arith.constant dense<0.000000e+00> : vector<16x128xf32>
    %10 = tpu.matmul %8, %9, %cst_8 {dimension_numbers = #tpu.dot_dimension_numbers<[1], [0], [0], [1], [0, 0, 1, 1], [], []>} : vector<16x128xbf16>, vector<128x128xbf16>, vector<16x128xf32> -> vector<16x128xf32>
    %c0_9 = arith.constant 0 : index
    %c0_10 = arith.constant 0 : index
    %11 = vector.load %arg5[%c0_9, %c0_10] : memref<1x128xf32, #tpu.memory_space<vmem>>, vector<1x128xf32>
    %12 = vector.broadcast %11 : vector<1x128xf32> to vector<16x128xf32>
    %13 = arith.addf %10, %12 : vector<16x128xf32>
    %14 = tpu.iota {dimensions = array<i32: 1>} : vector<16x128xi32>
    %c16_i32 = arith.constant 16 : i32
    %15 = vector.broadcast %c16_i32 : i32 to vector<16x128xi32>
    %16 = arith.cmpi slt, %14, %15 : vector<16x128xi32>
    %cst_11 = arith.constant -1.000000e+30 : f32
    %17 = vector.broadcast %cst_11 : f32 to vector<16x128xf32>
    %18 = arith.select %16, %13, %17 : vector<16x128xi1>, vector<16x128xf32>
    %cst_12 = arith.constant dense<0xFF800000> : vector<16xf32>
    %19 = vector.multi_reduction <maximumf>, %18, %cst_12 [1] : vector<16x128xf32> to vector<16xf32>
    %20 = vector.shape_cast %19 : vector<16xf32> to vector<16x1xf32>
    %21 = vector.broadcast %20 : vector<16x1xf32> to vector<16x128xf32>
    %22 = arith.subf %18, %21 : vector<16x128xf32>
    %23 = math.exp %22 : vector<16x128xf32>
    %cst_13 = arith.constant dense<0.000000e+00> : vector<16xf32>
    %24 = vector.multi_reduction <add>, %23, %cst_13 [1] : vector<16x128xf32> to vector<16xf32>
    %25 = vector.shape_cast %24 : vector<16xf32> to vector<16x1xf32>
    %26 = tpu.reciprocal %25 {approx = true} : vector<16x1xf32> -> vector<16x1xf32>
    %27 = vector.broadcast %26 : vector<16x1xf32> to vector<16x128xf32>
    %28 = arith.mulf %23, %27 : vector<16x128xf32>
    %c0_14 = arith.constant 0 : index
    %c0_15 = arith.constant 0 : index
    %29 = vector.load %arg6[%c0_14, %c0_15] : memref<16x128xf32, #tpu.memory_space<vmem>>, vector<16x128xf32>
    tpu.vector_store %arg6[%c0_14, %c0_15], %28 {strides = array<i32>} : memref<16x128xf32, #tpu.memory_space<vmem>>, vector<16x128xf32>,
    return
  }
  func.func @transform_0(%arg0: i32) -> (i32, i32) {
    %c0_i32 = arith.constant 0 : i32
    %c0_i32_0 = arith.constant 0 : i32
    return %arg0, %c0_i32 : i32, i32
  }
  func.func @transform_1(%arg0: i32) -> (i32, i32) {
    %c0_i32 = arith.constant 0 : i32
    %c0_i32_0 = arith.constant 0 : i32
    %c0_i32_1 = arith.constant 0 : i32
    return %c0_i32, %c0_i32_0 : i32, i32
  }
  func.func @transform_2(%arg0: i32) -> (i32, i32) {
    %c0_i32 = arith.constant 0 : i32
    %c0_i32_0 = arith.constant 0 : i32
    %c0_i32_1 = arith.constant 0 : i32
    return %c0_i32, %c0_i32_0 : i32, i32
  }
  func.func @transform_3(%arg0: i32) -> (i32, i32) {
    %c0_i32 = arith.constant 0 : i32
    %c0_i32_0 = arith.constant 0 : i32
    %c0_i32_1 = arith.constant 0 : i32
    return %c0_i32, %c0_i32_0 : i32, i32
  }
  func.func @transform_4(%arg0: i32) -> (i32, i32) {
    %c0_i32 = arith.constant 0 : i32
    %c0_i32_0 = arith.constant 0 : i32
    %c0_i32_1 = arith.constant 0 : i32
    return %c0_i32, %c0_i32_0 : i32, i32
  }
  func.func @transform_5(%arg0: i32) -> (i32, i32) {
    %c0_i32 = arith.constant 0 : i32
    %c0_i32_0 = arith.constant 0 : i32
    return %arg0, %c0_i32 : i32, i32
  }
}

</mosaic_0001>

<bundles_post_ra>
// kernel: tpu_custom_call.1
= control target key start
LH: loop header
LB: loop body
LE: loop exit
PB: predicated region body
PF: predicated region fallthrough
CT: control target
= control target key end

     0   :  { %10 = vsyncpa [#allocation3], 0  ;;  %s597_s0 = inlined_call_operand.hbm [shape: bf16[16,128], index: 0, kind: input, shape index: {}]   ;;  %s598_s1 = inlined_call_operand.hbm [shape: bf16[128,128], index: 1, kind: input, shape index: {}]   ;;  %s599_s2 = inlined_call_operand.vmem [shape: f32[1,128], index: 2, kind: input, shape index: {}]   ;;  %s600_s3 = inlined_call_operand.hbm [shape: bf16[128,128], index: 3, kind: input, shape index: {}]   ;;  %s601_s4 = inlined_call_operand.vmem [shape: f32[1,128], index: 4, kind: input, shape index: {}]   ;;  %s602_s5 = inlined_call_operand.hbm [shape: f32[16,128], index: 5, kind: output, shape index: {}]  }
   0x1   :  { %11 = vsyncpa [#allocation6], 0 }
   0x2   :  { %12 = vsyncpa [#allocation4], 0  ;;  %s539_s18 = smov [#allocation5]   ;;  %s540_s20 = smov [#allocation2]  }
   0x3   :  { %s30_s19 = sshll.u32 %s539_s18, 4  ;;  %s18_s21 = sshll.u32 %s540_s20, 4  ;;  %s31_s19 = int_to_ptr.vmem [resolvable:$true] %s30_s19  ;;  %s19_s21 = int_to_ptr.vmem [resolvable:$true] %s18_s21 }
   0x4   :  { %s461_s22 = scalar_lea.vmem %s31_s19, 1024  ;;  %p466_p1 = scmp.lt.s32.totalorder %s31_s19, %s31_s19 }
   0x5   :  { %p462_p0 = scmp.ne.s32.totalorder %s31_s19, %s461_s22  ;;  %p467_p2 = scmp.lt.s32.totalorder %s461_s22, %s461_s22 }
   0x7   :  { %p468_p3 = por %p467_p2, %p466_p1 }
   0x9   :  { %p469_p4 = pnand %p468_p3, %p462_p0 }
   0xb   :  { %472 = shalt.err (!%p469_p4)
}
   0xc   :  { %s541_s23 = smov 64   ;;  %s542_s24 = smov 4  }
   0xd   :  { %36 = dma.hbm_to_vmem [thread:$0]  %s598_s1, 1024, %s31_s19, [#allocation6], %s541_s23, %s541_s23, %s542_s24  }
   0xe   :  { %s481_s27 = scalar_lea.vmem %s19_s21, 128  ;;  %p486_p6 = scmp.lt.s32.totalorder %s19_s21, %s19_s21 }
   0xf   :  { %p482_p5 = scmp.ne.s32.totalorder %s19_s21, %s481_s27  ;;  %p487_p7 = scmp.lt.s32.totalorder %s481_s27, %s481_s27 }
  0x11   :  { %p488_p8 = por %p487_p7, %p486_p6 }
  0x13   :  { %p489_p9 = pnand %p488_p8, %p482_p5 }
  0x15   :  { %492 = shalt.err (!%p489_p9)
}
  0x16   :  { %24 = dma.hbm_to_vmem [thread:$0]  %s597_s0, 128, %s19_s21, [#allocation3], %s541_s23, %s541_s23, %s542_s24  }
  0x17   :  { %s543_s30 = smov [#allocation7]  }
  0x18   :  { %s44_s6 = sshll.u32 %s543_s30, 4  ;;  %s45_s6 = int_to_ptr.vmem [resolvable:$true] %s44_s6 }
  0x19   :  { %s501_s7 = scalar_lea.vmem %s45_s6, 1024  ;;  %p506_p11 = scmp.lt.s32.totalorder %s45_s6, %s45_s6 }
  0x1a   :  { %p502_p10 = scmp.ne.s32.totalorder %s45_s6, %s501_s7  ;;  %p507_p12 = scmp.lt.s32.totalorder %s501_s7, %s501_s7 }
  0x1c   :  { %p508_p13 = por %p507_p12, %p506_p11 }
  0x1e   :  { %p509_p0 = pnand %p508_p13, %p502_p10 }
  0x20   :  { %512 = shalt.err (!%p509_p0)
}
  0x21   :  { %50 = dma.hbm_to_vmem [thread:$0]  %s600_s3, 1024, %s45_s6, [#allocation6], %s541_s23, %s541_s23, %s542_s24  }
  0x22   :  { %533 = dma.done.wait [#allocation3], 128  }
  0x23   :  { %534 = vsyncadd [#allocation3], 4294967168 }
  0x24   :  { %535 = dma.done.wait [#allocation6], 2048  }
  0x25   :  { %536 = vsyncadd [#allocation6], 4294965248  ;;  %v544_v0 = vmov 0.0   ;;  %vm545_vm0 = vmmov 0   ;;  %v428_v1 = vld [vmem:[#allocation5 + $0x38] sm:$0xff]   ;;  %v429_v2 = vld [vmem:[#allocation5 + $0x30] sm:$0xff]   ;;  %v298_v28 = vlaneseq }
  0x26   :  { %378 = vmatprep.subr.bf16.mxu0 %v544_v0  ;;  %394 = vmatprep.mubr.msk.bf16.mxu0 %vm545_vm0, %v544_v0  ;;  %v430_v3 = vld [vmem:[#allocation5 + $0x28] sm:$0xff]   ;;  %v437_v4 = vld [vmem:[#allocation7 + $0x38] sm:$0xff]   ;;  %v431_v5 = vld [vmem:[#allocation5 + $0x20] sm:$0xff]  }
  0x27   :  { %398 = vmatprep.subr.bf16.mxu1 %v544_v0  ;;  %414 = vmatprep.mubr.msk.bf16.mxu1 %vm545_vm0, %v544_v0  ;;  %v438_v6 = vld [vmem:[#allocation7 + $0x30] sm:$0xff]   ;;  %v432_v7 = vld [vmem:[#allocation5 + $0x18] sm:$0xff]   ;;  %v439_v8 = vld [vmem:[#allocation7 + $0x28] sm:$0xff]   ;;  %v299_v29 = vand.u32 127, %v298_v28 }
  0x28   :  { %379 = vmatpush3.bf16.msra.mxu0 %v428_v1  ;;  %399 = vmatpush3.bf16.msra.mxu1 %v437_v4  ;;  %v433_v9 = vld [vmem:[#allocation5 + $0x10] sm:$0xff]   ;;  %v440_v10 = vld [vmem:[#allocation7 + $0x20] sm:$0xff]   ;;  %v434_v11 = vld [vmem:[#allocation5 + $0x8] sm:$0xff]  }
  0x29   :  { %380 = vmatprep.subr.bf16.mxu0 %v544_v0  ;;  %400 = vmatprep.subr.bf16.mxu1 %v544_v0  ;;  %v441_v12 = vld [vmem:[#allocation7 + $0x18] sm:$0xff]   ;;  %v435_v13 = vld [vmem:[#allocation5] sm:$0xff]   ;;  %v442_v15 = vld [vmem:[#allocation7 + $0x10] sm:$0xff]   ;;  %vm300_vm1 = vcmp.lt.s32.totalorder %v299_v29, 16 }
  0x2a   :  { %v436_v14 = vld [vmem:[#allocation2] sm:$0xff]   ;;  %v443_v16 = vld [vmem:[#allocation7 + $0x8] sm:$0xff]   ;;  %v444_v17 = vld [vmem:[#allocation7] sm:$0xff]  }
  0x2b   :  { %v341_v18 = vld [vmem:[%s599_s2] ss:$0 sm:$0xff]  ;;  %s546_s2 = smov [#allocation8]  }
  0x2c   :  { %381 = vmatpush3.bf16.msra.mxu0 %v429_v2  ;;  %401 = vmatpush3.bf16.msra.mxu1 %v438_v6  ;;  %v351_v30 = vld [vmem:[%s601_s4] ss:$0 sm:$0xff]  ;;  %s328_s4 = sshll.u32 %s546_s2, 4  ;;  %s329_s4 = int_to_ptr.vmem [resolvable:$true] %s328_s4 }
  0x2d   :  { %382 = vmatprep.subr.bf16.mxu0 %v544_v0  ;;  %402 = vmatprep.subr.bf16.mxu1 %v544_v0  ;;  %s513_s11 = scalar_lea.vmem %s329_s4, 256  ;;  %p518_p2 = scmp.lt.s32.totalorder %s329_s4, %s329_s4 }
  0x2e   :  { %p514_p1 = scmp.ne.s32.totalorder %s329_s4, %s513_s11  ;;  %p519_p3 = scmp.lt.s32.totalorder %s513_s11, %s513_s11 }
  0x30   :  { %383 = vmatpush3.bf16.msra.mxu0 %v430_v3  ;;  %403 = vmatpush3.bf16.msra.mxu1 %v439_v8  ;;  %p520_p4 = por %p519_p3, %p518_p2 }
  0x31   :  { %384 = vmatprep.subr.bf16.mxu0 %v544_v0  ;;  %404 = vmatprep.subr.bf16.mxu1 %v544_v0 }
  0x32   :  { %p521_p5 = pnand %p520_p4, %p514_p1 }
  0x34   :  { %385 = vmatpush3.bf16.msra.mxu0 %v431_v5  ;;  %405 = vmatpush3.bf16.msra.mxu1 %v440_v10 }
  0x35   :  { %386 = vmatprep.subr.bf16.mxu0 %v544_v0  ;;  %406 = vmatprep.subr.bf16.mxu1 %v544_v0 }
  0x38   :  { %387 = vmatpush3.bf16.msra.mxu0 %v432_v7  ;;  %407 = vmatpush3.bf16.msra.mxu1 %v441_v12 }
  0x39   :  { %388 = vmatprep.subr.bf16.mxu0 %v544_v0  ;;  %408 = vmatprep.subr.bf16.mxu1 %v544_v0 }
  0x3c   :  { %389 = vmatpush3.bf16.msra.mxu0 %v433_v9  ;;  %409 = vmatpush3.bf16.msra.mxu1 %v442_v15 }
  0x3d   :  { %390 = vmatprep.subr.bf16.mxu0 %v544_v0  ;;  %410 = vmatprep.subr.bf16.mxu1 %v544_v0 }
  0x40   :  { %391 = vmatpush3.bf16.msra.mxu0 %v434_v11  ;;  %411 = vmatpush3.bf16.msra.mxu1 %v443_v16 }
  0x41   :  { %392 = vmatprep.subr.bf16.mxu0 %v544_v0  ;;  %412 = vmatprep.subr.bf16.mxu1 %v544_v0 }
  0x44   :  { %393 = vmatpush3.bf16.msra.mxu0 %v435_v13  ;;  %413 = vmatpush3.bf16.msra.mxu1 %v444_v17 }
  0x47   :  { %395 = vmatmul.mubr.bf16.vlgmr.msra.gmra.mxu0 %v436_v14 }
 0x107   :  { %v176_v19 = vpop.f32.mrf.mxu0 }
 0x108   :  { %v177_v21 = vadd.f32 %v341_v18, %v176_v19 }
 0x109   :  { %v396_v20 = vpop.f32.mrf.mxu0 }
 0x10a   :  { %v183_v25 = vmax.f32 %v177_v21, 0.0 }
 0x10b   :  { %v179_v22 = vpop.f32.mrf.mxu0 }
 0x10c   :  { %v180_v23 = vadd.f32 %v341_v18, %v179_v22 }
 0x10d   :  { %v397_v24 = vpop.f32.mrf.mxu0 }
 0x10e   :  { %v184_v26 = vmax.f32 %v180_v23, 0.0 }
 0x110   :  { %v185_v27 = vpack.c.bf16 %v184_v26, %v183_v25 }
 0x112   :  { %415 = vmatmul.mubr.bf16.vlgmr.msra.gmra.mxu1 %v185_v27 }
 0x1d2   :  { %v291_v31 = vpop.f32.mrf.mxu1 }
 0x1d3   :  { %v292_v32 = vadd.f32 %v351_v30, %v291_v31 }
 0x1d4   :  { %v416_v33 = vpop.f32.mrf.mxu1 }
 0x1d5   :  { %v301_v34 = vsel %vm300_vm1, %v292_v32, -1e+30 }
 0x1d6   :  { %303 = vmax.xlane.f32.xlu0 %v301_v34  ;;  %v294_v35 = vpop.f32.mrf.mxu1 }
 0x1d7   :  { %v295_v36 = vadd.f32 %v351_v30, %v294_v35 }
 0x1d8   :  { %v417_v37 = vpop.f32.mrf.mxu1 }
 0x1d9   :  { %v302_v38 = vsel %vm300_vm1, %v295_v36, -1e+30 }
 0x1da   :  { %305 = vmax.xlane.f32.xlu0 %v302_v38 }
 0x25f   :  { %v304_v39 = vpop.xlane.xlu0 %303 }
 0x260   :  { %v307_v40 = vsub.f32 %v301_v34, %v304_v39 }
 0x262   :  { %v309_v41 = vmul.f32 1.442695, %v307_v40 }
 0x263   :  { %v306_v42 = vpop.xlane.xlu0 %305 }
 0x264   :  { %445 = vpow2.f32 %v309_v41  ;;  %v308_v43 = vsub.f32 %v302_v38, %v306_v42 }
 0x266   :  { %v311_v44 = vmul.f32 1.442695, %v308_v43 }
 0x268   :  { %447 = vpow2.f32 %v311_v44 }
 0x271   :  { %v446_v45 = vpop.eup %445 }
 0x272   :  { %313 = vadd.xlane.f32.xlu1 %v446_v45 }
 0x275   :  { %v448_v46 = vpop.eup %447 }
 0x276   :  { %315 = vadd.xlane.f32.xlu1 %v448_v46 }
 0x2fb   :  { %v314_v47 = vpop.xlane.xlu1 %313 }
 0x2fc   :  { %449 = vrcp.f32 %v314_v47 }
 0x2ff   :  { %v316_v48 = vpop.xlane.xlu1 %315 }
 0x300   :  { %451 = vrcp.f32 %v316_v48 }
 0x309   :  { %v450_v49 = vpop.eup %449 }
 0x30a   :  { %v319_v50 = vmul.f32 %v450_v49, %v446_v45 }
 0x30c   :  { %321 = vst [vmem:[#allocation8] sm:$0xff] %v319_v50 }
 0x30d   :  { %v452_v51 = vpop.eup %451 }
 0x30e   :  { %v320_v52 = vmul.f32 %v452_v51, %v448_v46 }
 0x310   :  { %322 = vst [vmem:[#allocation8 + $0x8] sm:$0xff] %v320_v52 }
 0x311   :  { %524 = shalt.err (!%p521_p5)
}
 0x312   :  { %s547_s12 = smov 128   ;;  %s548_s13 = smov 8  }
 0x313   :  { %334 = dma.vmem_to_hbm [thread:$0]  %s329_s4, 256, %s602_s5, [#allocation4], %s547_s12, %s547_s12, %s548_s13  }
 0x314   :  { %537 = dma.done.wait [#allocation4], 256  }
 0x315   :  { %538 = vsyncadd [#allocation4], 4294967040 }
 0x316   :  { %338 = vsyncpa [#allocation3], 1 }
 0x317   :  { %339 = vsyncpa [#allocation6], 1 }
 0x318   :  { %340 = vsyncpa [#allocation4], 1 }

</bundles_post_ra>
